<compile_context>
chip_gen: v5e
topology: v5e:2x2
jax: 0.10.0
libtpu: 0.0.40
codegen_flags: <defaults>
</compile_context>

<pallas_src>
import math
import functools

import jax
import jax.numpy as jnp
from jax.experimental import pallas as pl
from jax.experimental.pallas import tpu as pltpu


def _round_up(x, m):
    return ((x + m - 1) // m) * m


def _cast_pad(a, row_pad, col_pad, dtype):
    """Cast first (so any pad copy writes narrow elements), then zero-pad."""
    if a.dtype != dtype:
        a = a.astype(dtype)
    if row_pad or col_pad:
        a = jnp.pad(a, ((0, row_pad), (0, col_pad)))
    return a


def _vmem_cap_bytes():
    try:
        info = pltpu.get_tpu_info()
        cap = getattr(info, "vmem_capacity_bytes", None)
        if cap:
            return int(cap)
    except Exception:
        pass
    return 64 * 2**20  # conservative: v7x per-TensorCore physical VMEM


# ---------------------------------------------------------------------------
# Kernel 1: T = x @ W (+ b)  — materializes the small (N, out_ft) intermediate
# ---------------------------------------------------------------------------
def _xw_kernel(*refs, has_bias):
    if has_bias:
        x_ref, w_ref, b_ref, t_ref, acc_ref = refs
    else:
        x_ref, w_ref, t_ref, acc_ref = refs
        b_ref = None

    k = pl.program_id(2)
    prod = jnp.dot(x_ref[...], w_ref[...], preferred_element_type=jnp.float32)

    @pl.when(k == 0)
    def _():
        acc_ref[...] = prod            # write first product directly, no zero-fill

    @pl.when(k > 0)
    def _():
        acc_ref[...] += prod

    @pl.when(k == pl.num_programs(2) - 1)
    def _():
        out = acc_ref[...]
        if b_ref is not None:
            out = out + b_ref[...]     # bias added once, in the epilogue only
        t_ref[...] = out.astype(t_ref.dtype)


# ---------------------------------------------------------------------------
# Kernel 2: y = G @ T
# ---------------------------------------------------------------------------
def _gt_kernel(g_ref, t_ref, o_ref, acc_ref):
    k = pl.program_id(2)
    prod = jnp.dot(g_ref[...], t_ref[...], preferred_element_type=jnp.float32)

    @pl.when(k == 0)
    def _():
        acc_ref[...] = prod

    @pl.when(k > 0)
    def _():
        acc_ref[...] += prod

    @pl.when(k == pl.num_programs(2) - 1)
    def _():
        o_ref[...] = acc_ref[...].astype(o_ref.dtype)


def hgnn_conv_forward(x, G, weight, bias=None, *, compute_dtype=jnp.bfloat16):
    """y = G @ (x @ weight + bias) via two Pallas TPU kernels.

    compute_dtype is the MXU-input dtype (bf16 default). Accumulation is f32;
    the returned dtype matches x.dtype. Pass jnp.float32 for close agreement
    with the f32 PyTorch reference (bf16 is a documented precision trade-off).
    """
    N, in_ft = x.shape
    assert G.shape == (N, N), f"G must be (N, N), got {G.shape}"
    assert weight.shape[0] == in_ft
    out_ft = weight.shape[1]
    out_dtype = x.dtype
    has_bias = bias is not None

    esz = jnp.dtype(compute_dtype).itemsize
    osz = jnp.dtype(out_dtype).itemsize

    vmem_cap = _vmem_cap_bytes()
    vmem_budget = min(24 * 2**20, vmem_cap // 2)        # per-call working-set target
    vmem_limit_cap = min(40 * 2**20, vmem_cap // 2)     # hard cap on scoped VMEM ask

    # ---- node dimension: pad only to 128, tiles are the largest 128-multiple
    #      (<=512) that divides the padded extent.
    Np = _round_up(N, 128)
    TK = next(t for t in (512, 256, 128) if Np % t == 0)
    TM = TK
    if Np // TM < 2 and TM > 128:
        TM //= 2          # keep >=2 row tiles for v7x megacore when possible
    # TODO(synk): for N <= 128 the grid is (1, 1, k) and one v7x TensorCore idles;
    # acceptable at that problem size.

    # ---- output-feature dimension: lane-dense; prefer one column tile so the
    #      dominant N^2 G read streams from HBM exactly once (grid_n == 1).
    out_ft_pad = _round_up(out_ft, 128)
    tn_cands = []
    for d in (out_ft_pad, 1024, 512, 256, 128):
        if d <= out_ft_pad and out_ft_pad % d == 0 and d not in tn_cands:
            tn_cands.append(d)
    TN = 128
    for d in tn_cands:
        need = 2 * TM * TK * esz + 2 * TK * d * esz + 2 * TM * d * osz + TM * d * 4
        if need <= vmem_budget:
            TN = d
            break

    # ---- inner-feature dimension (contraction of x@W): full-extent block for
    #      typical HGNN widths, otherwise tiled at 512.
    if in_ft <= 2048:
        in_ft_pad, TKX = in_ft, in_ft
    else:
        in_ft_pad = _round_up(in_ft, 512)
        TKX = 512

    # ---- operands: cast-then-pad so the (cheap) pad pass writes narrow bytes.
    xp = _cast_pad(x, Np - N, in_ft_pad - in_ft, compute_dtype)
    Wp = _cast_pad(weight, in_ft_pad - in_ft, out_ft_pad - out_ft, compute_dtype)
    Gp = _cast_pad(G, Np - N, Np - N, compute_dtype)

    # ======================= kernel 1: T = x @ W (+ b) =======================
    grid1 = (Np // TM, out_ft_pad // TN, in_ft_pad // TKX)
    in_specs1 = [
        pl.BlockSpec((TM, TKX), lambda i, j, k: (i, k)),   # x row-tile
        pl.BlockSpec((TKX, TN), lambda i, j, k: (k, j)),   # W column-tile
    ]
    ops1 = [xp, Wp]
    if has_bias:
        b2 = jnp.pad(bias.astype(jnp.float32),
                     (0, out_ft_pad - out_ft)).reshape(1, out_ft_pad)
        ops1.append(b2)
        in_specs1.append(pl.BlockSpec((1, TN), lambda i, j, k: (0, j)))

    vmem1 = (2 * TM * TKX * esz + 2 * TKX * TN * esz + 2 * TM * TN * esz
             + TM * TN * 4 + 2 * TN * 4)
    t_mat = pl.pallas_call(
        functools.partial(_xw_kernel, has_bias=has_bias),
        out_shape=jax.ShapeDtypeStruct((Np, out_ft_pad), compute_dtype),
        grid_spec=pltpu.PrefetchScalarGridSpec(
            num_scalar_prefetch=0,
            grid=grid1,
            in_specs=in_specs1,
            out_specs=pl.BlockSpec((TM, TN), lambda i, j, k: (i, j)),
            scratch_shapes=[pltpu.VMEM((TM, TN), jnp.float32)],
        ),
        compiler_params=pltpu.CompilerParams(
            dimension_semantics=("parallel", "parallel", "arbitrary"),
            vmem_limit_bytes=int(min(max(2 * vmem1, 16 * 2**20), vmem_limit_cap)),
        ),
        cost_estimate=pl.CostEstimate(
            flops=int(2 * Np * in_ft_pad * out_ft_pad),
            transcendentals=0,
            bytes_accessed=int(Np * in_ft_pad * esz
                               + (out_ft_pad // TN) * in_ft_pad * out_ft_pad * esz
                               + Np * out_ft_pad * esz),
        ),
    )(*ops1)

    # ========================== kernel 2: y = G @ T ==========================
    grid2 = (Np // TM, out_ft_pad // TN, Np // TK)
    vmem2 = 2 * TM * TK * esz + 2 * TK * TN * esz + 2 * TM * TN * osz + TM * TN * 4
    yp = pl.pallas_call(
        _gt_kernel,
        out_shape=jax.ShapeDtypeStruct((Np, out_ft_pad), out_dtype),
        grid_spec=pltpu.PrefetchScalarGridSpec(
            num_scalar_prefetch=0,
            grid=grid2,
            in_specs=[
                pl.BlockSpec((TM, TK), lambda i, j, k: (i, k)),   # G tile
                pl.BlockSpec((TK, TN), lambda i, j, k: (k, j)),   # T tile
            ],
            out_specs=pl.BlockSpec((TM, TN), lambda i, j, k: (i, j)),
            scratch_shapes=[pltpu.VMEM((TM, TN), jnp.float32)],
        ),
        compiler_params=pltpu.CompilerParams(
            dimension_semantics=("parallel", "parallel", "arbitrary"),
            vmem_limit_bytes=int(min(max(2 * vmem2, 16 * 2**20), vmem_limit_cap)),
        ),
        cost_estimate=pl.CostEstimate(
            flops=int(2 * Np * Np * out_ft_pad),
            transcendentals=0,
            bytes_accessed=int((out_ft_pad // TN) * Np * Np * esz
                               + (Np // TM) * Np * out_ft_pad * esz
                               + Np * out_ft_pad * osz),
        ),
    )(Gp, t_mat)

    return yp[:N, :out_ft]


def init_hgnn_conv_params(key, in_ft, out_ft, use_bias=True):
    """Matches HGNN_conv.reset_parameters: uniform(-stdv, stdv), stdv=1/sqrt(out_ft)."""
    stdv = 1.0 / math.sqrt(out_ft)
    kw, kb = jax.random.split(key)
    weight = jax.random.uniform(
        kw, (in_ft, out_ft), minval=-stdv, maxval=stdv, dtype=jnp.float32
    )
    bias = (
        jax.random.uniform(kb, (out_ft,), minval=-stdv, maxval=stdv, dtype=jnp.float32)
        if use_bias
        else None
    )
    return weight, bias


if __name__ == "__main__":
    key = jax.random.PRNGKey(0)
    k_x, k_g, k_p = jax.random.split(key, 3)

    num_nodes = 64   # N (hypergraph propagation matrix is N x N)
    in_ft = 32
    out_ft = 16

    x = jax.random.normal(k_x, (num_nodes, in_ft), dtype=jnp.float32)
    G = jax.random.normal(k_g, (num_nodes, num_nodes), dtype=jnp.float32)
    weight, bias = init_hgnn_conv_params(k_p, in_ft, out_ft, use_bias=True)

    y_ref = G @ (x @ weight + bias)

    # f32 compute path: must match the PyTorch f32 reference tightly.
    y_f32 = hgnn_conv_forward(x, G, weight, bias, compute_dtype=jnp.float32)
    jax.block_until_ready(y_f32)
    assert y_f32.shape == (num_nodes, out_ft)
    assert jnp.allclose(y_f32, y_ref, atol=1e-4, rtol=1e-4), "f32 mismatch vs reference"

    # Default bf16 MXU path (f32 accumulation): loose tolerance, documented
    # precision trade-off rather than a bug.
    y_bf16 = hgnn_conv_forward(x, G, weight, bias)
    jax.block_until_ready(y_bf16)
    assert y_bf16.shape == (num_nodes, out_ft)
    assert jnp.allclose(y_bf16, y_ref, atol=1e-1, rtol=1e-1), "bf16 mismatch vs reference"

    print("KERNEL_OK")
</pallas_src>

<mosaic_0001>
module attributes {stable_mosaic.version = 11 : i64} {
  func.func @_xw_kernel(%arg0: i32, %arg1: i32, %arg2: i32, %arg3: memref<128x32xf32, #tpu.memory_space<vmem>>, %arg4: memref<32x128xf32, #tpu.memory_space<vmem>>, %arg5: memref<1x128xf32, #tpu.memory_space<vmem>>, %arg6: memref<128x128xf32, #tpu.memory_space<vmem>>, %arg7: memref<128x128xf32, #tpu.memory_space<vmem>>) attributes {dimension_semantics = [#tpu.dimension_semantics<parallel>, #tpu.dimension_semantics<parallel>, #tpu.dimension_semantics<arbitrary>], iteration_bounds = array<i64: 1, 1, 1>, scalar_prefetch = 0 : i64, scratch_operands = 1 : i64, tpu.core_type = #tpu.core_type<tc>, window_params = [{transform_indices = @transform_0, window_bounds = array<i64: 128, 32>}, {transform_indices = @transform_1, window_bounds = array<i64: 32, 128>}, {transform_indices = @transform_2, window_bounds = array<i64: 1, 128>}, {transform_indices = @transform_3, window_bounds = array<i64: 128, 128>}]} {
    %c0 = arith.constant 0 : index
    %c0_0 = arith.constant 0 : index
    %0 = vector.load %arg3[%c0, %c0_0] : memref<128x32xf32, #tpu.memory_space<vmem>>, vector<128x32xf32>
    %c0_1 = arith.constant 0 : index
    %c0_2 = arith.constant 0 : index
    %1 = vector.load %arg4[%c0_1, %c0_2] : memref<32x128xf32, #tpu.memory_space<vmem>>, vector<32x128xf32>
    %cst = arith.constant dense<0.000000e+00> : vector<128x128xf32>
    %2 = tpu.matmul %0, %1, %cst {dimension_numbers = #tpu.dot_dimension_numbers<[1], [0], [0], [1], [0, 0, 1, 1], [], []>} : vector<128x32xf32>, vector<32x128xf32>, vector<128x128xf32> -> vector<128x128xf32>
    %c0_i32 = arith.constant 0 : i32
    %3 = arith.cmpi eq, %arg2, %c0_i32 : i32
    %4 = arith.extui %3 : i1 to i32
    %c0_i32_3 = arith.constant 0 : i32
    %5 = arith.cmpi ne, %4, %c0_i32_3 : i32
    scf.if %5 {
      %c0_8 = arith.constant 0 : index
      %c0_9 = arith.constant 0 : index
      %12 = vector.load %arg7[%c0_8, %c0_9] : memref<128x128xf32, #tpu.memory_space<vmem>>, vector<128x128xf32>
      tpu.vector_store %arg7[%c0_8, %c0_9], %2 {strides = array<i32>} : memref<128x128xf32, #tpu.memory_space<vmem>>, vector<128x128xf32>,
    } else {
    }
    %c0_i32_4 = arith.constant 0 : i32
    %6 = arith.cmpi sgt, %arg2, %c0_i32_4 : i32
    %7 = arith.extui %6 : i1 to i32
    %c0_i32_5 = arith.constant 0 : i32
    %8 = arith.cmpi ne, %7, %c0_i32_5 : i32
    scf.if %8 {
      %c0_8 = arith.constant 0 : index
      %c0_9 = arith.constant 0 : index
      %12 = vector.load %arg7[%c0_8, %c0_9] : memref<128x128xf32, #tpu.memory_space<vmem>>, vector<128x128xf32>
      %13 = arith.addf %12, %2 : vector<128x128xf32>
      %c0_10 = arith.constant 0 : index
      %c0_11 = arith.constant 0 : index
      %14 = vector.load %arg7[%c0_10, %c0_11] : memref<128x128xf32, #tpu.memory_space<vmem>>, vector<128x128xf32>
      tpu.vector_store %arg7[%c0_10, %c0_11], %13 {strides = array<i32>} : memref<128x128xf32, #tpu.memory_space<vmem>>, vector<128x128xf32>,
    } else {
    }
    %c0_i32_6 = arith.constant 0 : i32
    %9 = arith.cmpi eq, %arg2, %c0_i32_6 : i32
    %10 = arith.extui %9 : i1 to i32
    %c0_i32_7 = arith.constant 0 : i32
    %11 = arith.cmpi ne, %10, %c0_i32_7 : i32
    scf.if %11 {
      %c0_8 = arith.constant 0 : index
      %c0_9 = arith.constant 0 : index
      %12 = vector.load %arg7[%c0_8, %c0_9] : memref<128x128xf32, #tpu.memory_space<vmem>>, vector<128x128xf32>
      %c0_10 = arith.constant 0 : index
      %c0_11 = arith.constant 0 : index
      %13 = vector.load %arg5[%c0_10, %c0_11] : memref<1x128xf32, #tpu.memory_space<vmem>>, vector<1x128xf32>
      %14 = vector.broadcast %13 : vector<1x128xf32> to vector<128x128xf32>
      %15 = arith.addf %12, %14 : vector<128x128xf32>
      %c0_12 = arith.constant 0 : index
      %c0_13 = arith.constant 0 : index
      %16 = vector.load %arg6[%c0_12, %c0_13] : memref<128x128xf32, #tpu.memory_space<vmem>>, vector<128x128xf32>
      tpu.vector_store %arg6[%c0_12, %c0_13], %15 {strides = array<i32>} : memref<128x128xf32, #tpu.memory_space<vmem>>, vector<128x128xf32>,
    } else {
    }
    return
  }
  func.func @transform_0(%arg0: i32, %arg1: i32, %arg2: i32) -> (i32, i32) {
    %c0_i32 = arith.constant 0 : i32
    return %arg0, %arg2 : i32, i32
  }
  func.func @transform_1(%arg0: i32, %arg1: i32, %arg2: i32) -> (i32, i32) {
    %c0_i32 = arith.constant 0 : i32
    return %arg2, %arg1 : i32, i32
  }
  func.func @transform_2(%arg0: i32, %arg1: i32, %arg2: i32) -> (i32, i32) {
    %c0_i32 = arith.constant 0 : i32
    %c0_i32_0 = arith.constant 0 : i32
    return %c0_i32, %arg1 : i32, i32
  }
  func.func @transform_3(%arg0: i32, %arg1: i32, %arg2: i32) -> (i32, i32) {
    %c0_i32 = arith.constant 0 : i32
    return %arg0, %arg1 : i32, i32
  }
}

</mosaic_0001>

<bundles_post_ra>
// kernel: tpu_custom_call.1
= control target key start
LH: loop header
LB: loop body
LE: loop exit
PB: predicated region body
PF: predicated region fallthrough
CT: control target
= control target key end

     0   :  { %vm35_vm0 = vcmask 261120   ;;  %s457_s0 = inlined_call_operand.vmem [shape: f32[128,32], index: 0, kind: input, shape index: {}]   ;;  %s458_s1 = inlined_call_operand.vmem [shape: f32[32,128], index: 1, kind: input, shape index: {}]   ;;  %s459_s2 = inlined_call_operand.vmem [shape: f32[1,128], index: 2, kind: input, shape index: {}]   ;;  %s460_s3 = inlined_call_operand.hbm [shape: f32[128,128], index: 3, kind: output, shape index: {}]  }
   0x1   :  { %v34_v0 = vld [vmem:[%s458_s1 + $0x18] sm:$0xff]  ;;  %v33_v1 = vld [vmem:[%s458_s1 + $0x10] sm:$0xff]  ;;  %v32_v2 = vld [vmem:[%s458_s1 + $0x8] sm:$0xff] }
   0x2   :  { %311 = vmatpush.msra.mxu2 %v34_v0  ;;  %312 = vmatpush.msra.mxu3 %v34_v0  ;;  %v31_v3 = vld [vmem:[%s458_s1] sm:$0xff] }
   0x3   :  { %96 = vmatpush.msra.mxu0 %v34_v0  ;;  %310 = vmatpush.msra.mxu1 %v34_v0  ;;  %v23_v4 = vld [vmem:[%s457_s0 + $0x40] sm:$0xff] }
   0x4   :  { %314 = vmatpush.msra.mxu2 %v33_v1  ;;  %315 = vmatpush.msra.mxu3 %v33_v1  ;;  %v27_v5 = vld [vmem:[%s457_s0 + $0x60] sm:$0xff] }
   0x5   :  { %97 = vmatpush.msra.mxu0 %v33_v1  ;;  %313 = vmatpush.msra.mxu1 %v33_v1  ;;  %v15_v6 = vld [vmem:[%s457_s0] sm:$0xff] }
   0x6   :  { %317 = vmatpush.msra.mxu2 %v32_v2  ;;  %318 = vmatpush.msra.mxu3 %v32_v2  ;;  %v19_v7 = vld [vmem:[%s457_s0 + $0x20] sm:$0xff] }
   0x7   :  { %98 = vmatpush.msra.mxu0 %v32_v2  ;;  %316 = vmatpush.msra.mxu1 %v32_v2 }
   0x8   :  { %320 = vmatpush.msra.mxu2 %v31_v3  ;;  %321 = vmatpush.msra.mxu3 %v31_v3 }
   0x9   :  { %8 = vsyncpa [#allocation4], 0  ;;  %302 = vmatmul.msk.f32.vlgmr.msra.gmra.mxu2 %vm35_vm0, %v23_v4  ;;  %306 = vmatmul.msk.f32.vlgmr.msra.gmra.mxu3 %vm35_vm0, %v27_v5  ;;  %v24_v8 = vld [vmem:[%s457_s0 + $0x48] sm:$0xff]  ;;  %v25_v12 = vld [vmem:[%s457_s0 + $0x50] sm:$0xff]  ;;  %s282_s27 = sshll.u32 %s460_s3, 4  ;;  %s353_s28 = smov 128   ;;  %s283_s27 = int_to_ptr.hbm [resolvable:$true] %s282_s27 }
   0xa   :  { %99 = vmatpush.msra.mxu0 %v31_v3  ;;  %319 = vmatpush.msra.mxu1 %v31_v3  ;;  %v28_v9 = vld [vmem:[%s457_s0 + $0x68] sm:$0xff]  ;;  %v29_v13 = vld [vmem:[%s457_s0 + $0x70] sm:$0xff]  ;;  %v26_v16 = vld [vmem:[%s457_s0 + $0x58] sm:$0xff]  ;;  %s354_s29 = smov 8  }
   0xb   :  { %294 = vmatmul.msk.f32.vlgmr.msra.gmra.mxu0 %vm35_vm0, %v15_v6  ;;  %298 = vmatmul.msk.f32.vlgmr.msra.gmra.mxu1 %vm35_vm0, %v19_v7  ;;  %v16_v10 = vld [vmem:[%s457_s0 + $0x8] sm:$0xff]  ;;  %v17_v14 = vld [vmem:[%s457_s0 + $0x10] sm:$0xff]  ;;  %v30_v17 = vld [vmem:[%s457_s0 + $0x78] sm:$0xff] }
   0xc   :  { %v20_v11 = vld [vmem:[%s457_s0 + $0x28] sm:$0xff]  ;;  %v21_v15 = vld [vmem:[%s457_s0 + $0x30] sm:$0xff]  ;;  %v18_v18 = vld [vmem:[%s457_s0 + $0x18] sm:$0xff] }
   0xd   :  { %v22_v19 = vld [vmem:[%s457_s0 + $0x38] sm:$0xff]  ;;  %v325_v20 = vld [vmem:[%s459_s2] ss:$0 sm:$0xff]  ;;  %s352_s0 = smov [#allocation3]  }
   0xe   :  { %s280_s2 = sshll.u32 %s352_s0, 4  ;;  %s281_s2 = int_to_ptr.vmem [resolvable:$true] %s280_s2 }
  0x11   :  { %303 = vmatmul.msk.f32.gmra.mxu2 %vm35_vm0, %v24_v8  ;;  %307 = vmatmul.msk.f32.gmra.mxu3 %vm35_vm0, %v28_v9 }
  0x13   :  { %295 = vmatmul.msk.f32.gmra.mxu0 %vm35_vm0, %v16_v10  ;;  %299 = vmatmul.msk.f32.gmra.mxu1 %vm35_vm0, %v20_v11 }
  0x19   :  { %304 = vmatmul.msk.f32.gmra.mxu2 %vm35_vm0, %v25_v12  ;;  %308 = vmatmul.msk.f32.gmra.mxu3 %vm35_vm0, %v29_v13 }
  0x1b   :  { %296 = vmatmul.msk.f32.gmra.mxu0 %vm35_vm0, %v17_v14  ;;  %300 = vmatmul.msk.f32.gmra.mxu1 %vm35_vm0, %v21_v15 }
  0x21   :  { %305 = vmatmul.msk.f32.gmra.mxu2 %vm35_vm0, %v26_v16  ;;  %309 = vmatmul.msk.f32.gmra.mxu3 %vm35_vm0, %v30_v17 }
  0x23   :  { %297 = vmatmul.msk.f32.gmra.mxu0 %vm35_vm0, %v18_v18  ;;  %301 = vmatmul.msk.f32.gmra.mxu1 %vm35_vm0, %v22_v19 }
  0x88   :  { %v101_v21 = vpop.f32.mrf.mxu0  ;;  %v113_v22 = vpop.f32.mrf.mxu1 }
  0x89   :  { %v244_v23 = vadd.f32 %v325_v20, %v101_v21  ;;  %v248_v24 = vadd.f32 %v325_v20, %v113_v22 }
  0x8b   :  { %260 = vst [vmem:[#allocation3] sm:$0xff] %v244_v23 }
  0x8c   :  { %264 = vst [vmem:[#allocation3 + $0x20] sm:$0xff] %v248_v24  ;;  %v125_v25 = vpop.f32.mrf.mxu2  ;;  %v137_v26 = vpop.f32.mrf.mxu3 }
  0x8d   :  { %v252_v27 = vadd.f32 %v325_v20, %v125_v25  ;;  %v256_v28 = vadd.f32 %v325_v20, %v137_v26 }
  0x8f   :  { %268 = vst [vmem:[#allocation3 + $0x40] sm:$0xff] %v252_v27 }
  0x90   :  { %272 = vst [vmem:[#allocation3 + $0x60] sm:$0xff] %v256_v28  ;;  %v104_v29 = vpop.f32.mrf.mxu0  ;;  %v116_v30 = vpop.f32.mrf.mxu1 }
  0x91   :  { %v245_v31 = vadd.f32 %v325_v20, %v104_v29  ;;  %v249_v32 = vadd.f32 %v325_v20, %v116_v30 }
  0x93   :  { %261 = vst [vmem:[#allocation3 + $0x8] sm:$0xff] %v245_v31 }
  0x94   :  { %265 = vst [vmem:[#allocation3 + $0x28] sm:$0xff] %v249_v32  ;;  %v128_v33 = vpop.f32.mrf.mxu2  ;;  %v140_v34 = vpop.f32.mrf.mxu3 }
  0x95   :  { %v253_v35 = vadd.f32 %v325_v20, %v128_v33  ;;  %v257_v36 = vadd.f32 %v325_v20, %v140_v34 }
  0x97   :  { %269 = vst [vmem:[#allocation3 + $0x48] sm:$0xff] %v253_v35 }
  0x98   :  { %273 = vst [vmem:[#allocation3 + $0x68] sm:$0xff] %v257_v36  ;;  %v107_v37 = vpop.f32.mrf.mxu0  ;;  %v119_v38 = vpop.f32.mrf.mxu1 }
  0x99   :  { %v246_v39 = vadd.f32 %v325_v20, %v107_v37  ;;  %v250_v40 = vadd.f32 %v325_v20, %v119_v38 }
  0x9b   :  { %262 = vst [vmem:[#allocation3 + $0x10] sm:$0xff] %v246_v39 }
  0x9c   :  { %266 = vst [vmem:[#allocation3 + $0x30] sm:$0xff] %v250_v40  ;;  %v131_v41 = vpop.f32.mrf.mxu2  ;;  %v143_v42 = vpop.f32.mrf.mxu3 }
  0x9d   :  { %v254_v43 = vadd.f32 %v325_v20, %v131_v41  ;;  %v258_v44 = vadd.f32 %v325_v20, %v143_v42 }
  0x9f   :  { %270 = vst [vmem:[#allocation3 + $0x50] sm:$0xff] %v254_v43 }
  0xa0   :  { %274 = vst [vmem:[#allocation3 + $0x70] sm:$0xff] %v258_v44  ;;  %v110_v45 = vpop.f32.mrf.mxu0  ;;  %v122_v46 = vpop.f32.mrf.mxu1 }
  0xa1   :  { %v247_v47 = vadd.f32 %v325_v20, %v110_v45  ;;  %v251_v48 = vadd.f32 %v325_v20, %v122_v46 }
  0xa3   :  { %263 = vst [vmem:[#allocation3 + $0x18] sm:$0xff] %v247_v47 }
  0xa4   :  { %267 = vst [vmem:[#allocation3 + $0x38] sm:$0xff] %v251_v48  ;;  %v134_v49 = vpop.f32.mrf.mxu2  ;;  %v146_v50 = vpop.f32.mrf.mxu3 }
  0xa5   :  { %v255_v51 = vadd.f32 %v325_v20, %v134_v49  ;;  %v259_v52 = vadd.f32 %v325_v20, %v146_v50 }
  0xa7   :  { %271 = vst [vmem:[#allocation3 + $0x58] sm:$0xff] %v255_v51 }
  0xa8   :  { %275 = vst [vmem:[#allocation3 + $0x78] sm:$0xff] %v259_v52 }
  0xa9   :  { %288 = dma.vmem_to_hbm [thread:$0]  %s281_s2, 2048, %s283_s27, [#allocation4], %s353_s28, %s353_s28, %s354_s29  }
  0xaa   :  { %350 = dma.done.wait [#allocation4], 2048  }
  0xab   :  { %351 = vsyncadd [#allocation4], 4294965248 }
  0xac   :  { %293 = vsyncpa [#allocation4], 1 }

</bundles_post_ra>
